<compile_context>
chip_gen: v6e
topology: v6e:2x2x1
jax: 0.10.0
libtpu: 0.0.40
codegen_flags: <defaults>
</compile_context>

<pallas_src>
import functools

import jax
import jax.numpy as jnp
from jax import lax
from jax.experimental import pallas as pl
from jax.experimental.pallas import tpu as pltpu


def _round_up(x, m):
    return ((x + m - 1) // m) * m


def _mlp_kernel(x_ref, w1_ref, b1_ref, w2_ref, b2_ref, w3_ref, b3_ref, o_ref):
    # x_ref:  [TILE_B, in]      f32   (original batch-major layout from HBM)
    # wN_ref: [out_n, in_n]     bf16  (PyTorch weight layout, VMEM-resident)
    # bN_ref: [out_n, 1]        f32   (broadcasts along the lane/batch axis)
    # o_ref:  [out, TILE_B]     bf16  (batch on the lane axis -> unmasked vst)
    xb = x_ref[...].astype(jnp.bfloat16)  # cheap VPU cast; layout fix is on-chip

    # fc1 + ReLU:  h1 = W1 @ x^T  (contract the feature axis of both operands)
    h1 = lax.dot_general(w1_ref[...], xb, (((1,), (1,)), ((), ())),
                         preferred_element_type=jnp.float32)       # [h1, tb]
    h1 = jnp.maximum(h1 + b1_ref[...], 0.0)

    # fc2 + ReLU
    h2 = jnp.dot(w2_ref[...], h1.astype(jnp.bfloat16),
                 preferred_element_type=jnp.float32)                # [h2, tb]
    h2 = jnp.maximum(h2 + b2_ref[...], 0.0)

    # fc3 + sigmoid
    z3 = jnp.dot(w3_ref[...], h2.astype(jnp.bfloat16),
                 preferred_element_type=jnp.float32)                # [out, tb]
    o_ref[...] = jax.nn.sigmoid(z3 + b3_ref[...]).astype(o_ref.dtype)


@functools.partial(jax.jit, static_argnames=("tile_b",))
def genetic_nn_forward(x, params, *, tile_b=8192):
    """Fused GeneticNN forward.

    x: [B, input_size] float32 (batch-major, as produced by the caller)
    params: PyTorch-layout params: wN [out_n, in_n], bN [out_n]  (float32)
    returns: [B, output_size] float32
    """
    w1, b1 = params["w1"], params["b1"]
    w2, b2 = params["w2"], params["b2"]
    w3, b3 = params["w3"], params["b3"]

    B, in_size = x.shape
    h1_size = w1.shape[0]
    h2_size = w2.shape[0]
    out_size = w3.shape[0]

    # Batch tile: large (amortize the ~0.35us per-step overhead), multiple of
    # 256 (MXU/lane friendly), and clamped to ~B/2 so that whenever B is big
    # enough the "parallel" grid axis has >= 2 steps (both TCs on v7x).
    tb = min(tile_b, _round_up(pl.cdiv(B, 2), 256))
    tb = _round_up(max(tb, 256), 256)
    grid_b = pl.cdiv(B, tb)  # ragged last block allowed: OOB lanes are discarded

    # Tiny one-time casts; fused/const-folded under this jit.  (Callers doing
    # many generations can also cache bf16 weights alongside the f32 params.)
    w1b, w2b, w3b = (w.astype(jnp.bfloat16) for w in (w1, w2, w3))
    b1c = b1.astype(jnp.float32).reshape(h1_size, 1)
    b2c = b2.astype(jnp.float32).reshape(h2_size, 1)
    b3c = b3.astype(jnp.float32).reshape(out_size, 1)

    # Weights/biases: constant index_map -> VMEM-resident across the grid.
    def resident(shape):
        return pl.BlockSpec(shape, lambda i: (0,) * len(shape))

    flops = 2 * B * (in_size * h1_size + h1_size * h2_size + h2_size * out_size)
    bytes_accessed = (
        B * in_size * 4                                   # x read (f32, once)
        + (w1b.size + w2b.size + w3b.size) * 2            # bf16 weights
        + (b1c.size + b2c.size + b3c.size) * 4            # f32 biases
        + B * out_size * 2                                 # bf16 output
    )

    out_t = pl.pallas_call(
        _mlp_kernel,
        out_shape=jax.ShapeDtypeStruct((out_size, B), jnp.bfloat16),
        grid=(grid_b,),
        in_specs=[
            pl.BlockSpec((tb, in_size), lambda i: (i, 0)),   # x: streamed per tile
            resident(w1b.shape), resident(b1c.shape),
            resident(w2b.shape), resident(b2c.shape),
            resident(w3b.shape), resident(b3c.shape),
        ],
        out_specs=pl.BlockSpec((out_size, tb), lambda i: (0, i)),
        compiler_params=pltpu.CompilerParams(
            dimension_semantics=("parallel",)),               # 2 TCs on v7x
        cost_estimate=pl.CostEstimate(
            flops=flops,
            transcendentals=B * out_size,
            bytes_accessed=bytes_accessed),
    )(x, w1b, b1c, w2b, b2c, w3b, b3c)

    # Back to batch-major [B, out] f32 (fused under this jit; upcast is free
    # because the transpose already touches every element).
    return jnp.transpose(out_t).astype(jnp.float32)


def init_params(key, input_size, hidden1, hidden2, output_size):
    """Deterministic init mimicking nn.Linear's U(-1/sqrt(fan_in), 1/sqrt(fan_in)).

    Weights stored in PyTorch layout: [out_features, in_features]."""
    ks = jax.random.split(key, 6)

    def linear(kw, kb, fan_in, fan_out):
        bound = 1.0 / jnp.sqrt(jnp.float32(fan_in))
        w = jax.random.uniform(kw, (fan_out, fan_in), jnp.float32, -bound, bound)
        b = jax.random.uniform(kb, (fan_out,), jnp.float32, -bound, bound)
        return w, b

    w1, b1 = linear(ks[0], ks[1], input_size, hidden1)
    w2, b2 = linear(ks[2], ks[3], hidden1, hidden2)
    w3, b3 = linear(ks[4], ks[5], hidden2, output_size)
    return {"w1": w1, "b1": b1, "w2": w2, "b2": b2, "w3": w3, "b3": b3}


def reference_forward_f32(x, p):
    h1 = jnp.maximum(x @ p["w1"].T + p["b1"], 0.0)
    h2 = jnp.maximum(h1 @ p["w2"].T + p["b2"], 0.0)
    return jax.nn.sigmoid(h2 @ p["w3"].T + p["b3"])


def reference_forward_bf16(x, p):
    # Same bf16-input / f32-accumulate / bf16-output recipe as the kernel.
    h1 = jnp.dot(x.astype(jnp.bfloat16), p["w1"].T.astype(jnp.bfloat16),
                 preferred_element_type=jnp.float32) + p["b1"]
    h1 = jnp.maximum(h1, 0.0)
    h2 = jnp.dot(h1.astype(jnp.bfloat16), p["w2"].T.astype(jnp.bfloat16),
                 preferred_element_type=jnp.float32) + p["b2"]
    h2 = jnp.maximum(h2, 0.0)
    z3 = jnp.dot(h2.astype(jnp.bfloat16), p["w3"].T.astype(jnp.bfloat16),
                 preferred_element_type=jnp.float32) + p["b3"]
    return jax.nn.sigmoid(z3).astype(jnp.bfloat16).astype(jnp.float32)


if __name__ == "__main__":
    # Small shapes consistent with the module's forward.
    batch, input_size, hidden1, hidden2, output_size = 8, 16, 32, 32, 8

    key = jax.random.PRNGKey(0)
    k_x, k_p, k_x2 = jax.random.split(key, 3)
    x = jax.random.normal(k_x, (batch, input_size), dtype=jnp.float32)
    params = init_params(k_p, input_size, hidden1, hidden2, output_size)

    out = genetic_nn_forward(x, params)
    out = jax.block_until_ready(out)
    assert out.shape == (batch, output_size)

    # Bit-for-bit-ish check against the same bf16/f32 recipe in plain JAX.
    ref_bf16 = reference_forward_bf16(x, params)
    assert jnp.allclose(out, ref_bf16, atol=1e-2, rtol=1e-2)

    # Semantic check against the pure-f32 PyTorch-equivalent forward.
    ref_f32 = reference_forward_f32(x, params)
    assert jnp.allclose(out, ref_f32, atol=5e-2, rtol=5e-2)

    # Exercise multiple grid steps + a ragged last block (no padding path).
    x2 = jax.random.normal(k_x2, (777, input_size), dtype=jnp.float32)
    out2 = jax.block_until_ready(genetic_nn_forward(x2, params, tile_b=256))
    assert out2.shape == (777, output_size)
    assert jnp.allclose(out2, reference_forward_f32(x2, params),
                        atol=5e-2, rtol=5e-2)

    print("KERNEL_OK")
</pallas_src>

<mosaic_0001>
module attributes {stable_mosaic.version = 11 : i64} {
  func.func @_mlp_kernel(%arg0: i32, %arg1: memref<256x16xf32, #tpu.memory_space<vmem>>, %arg2: memref<32x16xbf16, #tpu.memory_space<vmem>>, %arg3: memref<32x1xf32, #tpu.memory_space<vmem>>, %arg4: memref<32x32xbf16, #tpu.memory_space<vmem>>, %arg5: memref<32x1xf32, #tpu.memory_space<vmem>>, %arg6: memref<8x32xbf16, #tpu.memory_space<vmem>>, %arg7: memref<8x1xf32, #tpu.memory_space<vmem>>, %arg8: memref<8x256xbf16, #tpu.memory_space<vmem>>) attributes {dimension_semantics = [#tpu.dimension_semantics<parallel>], iteration_bounds = array<i64: 1>, scalar_prefetch = 0 : i64, scratch_operands = 0 : i64, tpu.core_type = #tpu.core_type<tc>, window_params = [{transform_indices = @transform_0, window_bounds = array<i64: 256, 16>}, {pipeline_mode = #tpu.pipeline_mode<synchronous>, transform_indices = @transform_1, window_bounds = array<i64: 32, 16>}, {pipeline_mode = #tpu.pipeline_mode<synchronous>, transform_indices = @transform_2, window_bounds = array<i64: 32, 1>}, {pipeline_mode = #tpu.pipeline_mode<synchronous>, transform_indices = @transform_3, window_bounds = array<i64: 32, 32>}, {pipeline_mode = #tpu.pipeline_mode<synchronous>, transform_indices = @transform_4, window_bounds = array<i64: 32, 1>}, {pipeline_mode = #tpu.pipeline_mode<synchronous>, transform_indices = @transform_5, window_bounds = array<i64: 8, 32>}, {pipeline_mode = #tpu.pipeline_mode<synchronous>, transform_indices = @transform_6, window_bounds = array<i64: 8, 1>}, {transform_indices = @transform_7, window_bounds = array<i64: 8, 256>}]} {
    %c0 = arith.constant 0 : index
    %c0_0 = arith.constant 0 : index
    %0 = vector.load %arg1[%c0, %c0_0] : memref<256x16xf32, #tpu.memory_space<vmem>>, vector<256x16xf32>
    %1 = arith.truncf %0 : vector<256x16xf32> to vector<256x16xbf16>
    %c0_1 = arith.constant 0 : index
    %c0_2 = arith.constant 0 : index
    %2 = vector.load %arg2[%c0_1, %c0_2] : memref<32x16xbf16, #tpu.memory_space<vmem>>, vector<32x16xbf16>
    %cst = arith.constant dense<0.000000e+00> : vector<32x256xf32>
    %3 = tpu.matmul %2, %1, %cst {dimension_numbers = #tpu.dot_dimension_numbers<[1], [1], [0], [0], [0, 0, 1, 0], [], []>} : vector<32x16xbf16>, vector<256x16xbf16>, vector<32x256xf32> -> vector<32x256xf32>
    %c0_3 = arith.constant 0 : index
    %c0_4 = arith.constant 0 : index
    %4 = vector.load %arg3[%c0_3, %c0_4] : memref<32x1xf32, #tpu.memory_space<vmem>>, vector<32x1xf32>
    %5 = vector.broadcast %4 : vector<32x1xf32> to vector<32x256xf32>
    %6 = arith.addf %3, %5 : vector<32x256xf32>
    %cst_5 = arith.constant 0.000000e+00 : f32
    %7 = vector.broadcast %cst_5 : f32 to vector<32x256xf32>
    %8 = arith.maximumf %6, %7 : vector<32x256xf32>
    %c0_6 = arith.constant 0 : index
    %c0_7 = arith.constant 0 : index
    %9 = vector.load %arg4[%c0_6, %c0_7] : memref<32x32xbf16, #tpu.memory_space<vmem>>, vector<32x32xbf16>
    %10 = arith.truncf %8 : vector<32x256xf32> to vector<32x256xbf16>
    %cst_8 = arith.constant dense<0.000000e+00> : vector<32x256xf32>
    %11 = tpu.matmul %9, %10, %cst_8 {dimension_numbers = #tpu.dot_dimension_numbers<[1], [0], [0], [1], [0, 0, 1, 1], [], []>} : vector<32x32xbf16>, vector<32x256xbf16>, vector<32x256xf32> -> vector<32x256xf32>
    %c0_9 = arith.constant 0 : index
    %c0_10 = arith.constant 0 : index
    %12 = vector.load %arg5[%c0_9, %c0_10] : memref<32x1xf32, #tpu.memory_space<vmem>>, vector<32x1xf32>
    %13 = vector.broadcast %12 : vector<32x1xf32> to vector<32x256xf32>
    %14 = arith.addf %11, %13 : vector<32x256xf32>
    %cst_11 = arith.constant 0.000000e+00 : f32
    %15 = vector.broadcast %cst_11 : f32 to vector<32x256xf32>
    %16 = arith.maximumf %14, %15 : vector<32x256xf32>
    %c0_12 = arith.constant 0 : index
    %c0_13 = arith.constant 0 : index
    %17 = vector.load %arg6[%c0_12, %c0_13] : memref<8x32xbf16, #tpu.memory_space<vmem>>, vector<8x32xbf16>
    %18 = arith.truncf %16 : vector<32x256xf32> to vector<32x256xbf16>
    %cst_14 = arith.constant dense<0.000000e+00> : vector<8x256xf32>
    %19 = tpu.matmul %17, %18, %cst_14 {dimension_numbers = #tpu.dot_dimension_numbers<[1], [0], [0], [1], [0, 0, 1, 1], [], []>} : vector<8x32xbf16>, vector<32x256xbf16>, vector<8x256xf32> -> vector<8x256xf32>
    %c0_15 = arith.constant 0 : index
    %c0_16 = arith.constant 0 : index
    %20 = vector.load %arg7[%c0_15, %c0_16] : memref<8x1xf32, #tpu.memory_space<vmem>>, vector<8x1xf32>
    %21 = vector.broadcast %20 : vector<8x1xf32> to vector<8x256xf32>
    %22 = arith.addf %19, %21 : vector<8x256xf32>
    %23 = arith.negf %22 : vector<8x256xf32>
    %24 = math.exp %23 : vector<8x256xf32>
    %cst_17 = arith.constant 1.000000e+00 : f32
    %25 = vector.broadcast %cst_17 : f32 to vector<8x256xf32>
    %26 = arith.addf %25, %24 : vector<8x256xf32>
    %27 = arith.divf %25, %26 : vector<8x256xf32>
    %28 = arith.truncf %27 : vector<8x256xf32> to vector<8x256xbf16>
    %c0_18 = arith.constant 0 : index
    %c0_19 = arith.constant 0 : index
    %29 = vector.load %arg8[%c0_18, %c0_19] : memref<8x256xbf16, #tpu.memory_space<vmem>>, vector<8x256xbf16>
    tpu.vector_store %arg8[%c0_18, %c0_19], %28 {strides = array<i32>} : memref<8x256xbf16, #tpu.memory_space<vmem>>, vector<8x256xbf16>,
    return
  }
  func.func @transform_0(%arg0: i32) -> (i32, i32) {
    %c0_i32 = arith.constant 0 : i32
    %c0_i32_0 = arith.constant 0 : i32
    return %arg0, %c0_i32 : i32, i32
  }
  func.func @transform_1(%arg0: i32) -> (i32, i32) {
    %c0_i32 = arith.constant 0 : i32
    %c0_i32_0 = arith.constant 0 : i32
    %c0_i32_1 = arith.constant 0 : i32
    return %c0_i32, %c0_i32_0 : i32, i32
  }
  func.func @transform_2(%arg0: i32) -> (i32, i32) {
    %c0_i32 = arith.constant 0 : i32
    %c0_i32_0 = arith.constant 0 : i32
    %c0_i32_1 = arith.constant 0 : i32
    return %c0_i32, %c0_i32_0 : i32, i32
  }
  func.func @transform_3(%arg0: i32) -> (i32, i32) {
    %c0_i32 = arith.constant 0 : i32
    %c0_i32_0 = arith.constant 0 : i32
    %c0_i32_1 = arith.constant 0 : i32
    return %c0_i32, %c0_i32_0 : i32, i32
  }
  func.func @transform_4(%arg0: i32) -> (i32, i32) {
    %c0_i32 = arith.constant 0 : i32
    %c0_i32_0 = arith.constant 0 : i32
    %c0_i32_1 = arith.constant 0 : i32
    return %c0_i32, %c0_i32_0 : i32, i32
  }
  func.func @transform_5(%arg0: i32) -> (i32, i32) {
    %c0_i32 = arith.constant 0 : i32
    %c0_i32_0 = arith.constant 0 : i32
    %c0_i32_1 = arith.constant 0 : i32
    return %c0_i32, %c0_i32_0 : i32, i32
  }
  func.func @transform_6(%arg0: i32) -> (i32, i32) {
    %c0_i32 = arith.constant 0 : i32
    %c0_i32_0 = arith.constant 0 : i32
    %c0_i32_1 = arith.constant 0 : i32
    return %c0_i32, %c0_i32_0 : i32, i32
  }
  func.func @transform_7(%arg0: i32) -> (i32, i32) {
    %c0_i32 = arith.constant 0 : i32
    %c0_i32_0 = arith.constant 0 : i32
    return %c0_i32, %arg0 : i32, i32
  }
}

</mosaic_0001>

<bundles_post_ra>
// kernel: genetic_nn_forward.1
= control target key start
LH: loop header
LB: loop body
LE: loop exit
PB: predicated region body
PF: predicated region fallthrough
CT: control target
= control target key end

     0   :  { %vm113_vm0 = vcmask 130048   ;;  %v512_v7 = vmov 0   ;;  %vm271_vm1 = vcmask 261120   ;;  %s726_s0 = inlined_call_operand.vmem [shape: f32[8,16], index: 0, kind: input, shape index: {}]   ;;  %s727_s1 = inlined_call_operand.vmem [shape: bf16[32,16], index: 1, kind: input, shape index: {}]   ;;  %s728_s2 = inlined_call_operand.vmem [shape: f32[32,1], index: 2, kind: input, shape index: {}]   ;;  %s729_s3 = inlined_call_operand.vmem [shape: bf16[32,32], index: 3, kind: input, shape index: {}]   ;;  %s730_s4 = inlined_call_operand.vmem [shape: f32[32,1], index: 4, kind: input, shape index: {}]   ;;  %s731_s5 = inlined_call_operand.vmem [shape: bf16[8,32], index: 5, kind: input, shape index: {}]   ;;  %s732_s6 = inlined_call_operand.vmem [shape: f32[8,1], index: 6, kind: input, shape index: {}]   ;;  %s733_s7 = inlined_call_operand.vmem [shape: bf16[8,8], index: 7, kind: output, shape index: {}]  }
   0x1   :  { %v57_v0 = vld [vmem:[%s726_s0 + $0xf0] sm:$0xff]  ;;  %v58_v1 = vld [vmem:[%s726_s0 + $0xf8] sm:$0xff]  ;;  %v55_v5 = vld [vmem:[%s726_s0 + $0xe0] sm:$0xff]  ;;  %498 = vset.pattern.permute.xlu0 %v512_v7  ;;  %499 = vset.pattern.permute.xlu1 %v512_v7 }
   0x2   :  { %v41_v2 = vld [vmem:[%s726_s0 + $0x70] sm:$0xff]  ;;  %v74_v3 = vpack.c.bf16 %v58_v1, %v57_v0  ;;  %v42_v4 = vld [vmem:[%s726_s0 + $0x78] sm:$0xff]  ;;  %v56_v6 = vld [vmem:[%s726_s0 + $0xe8] sm:$0xff]  ;;  %310 = vmatprep.mubr.bf16.mxu1 %v512_v7 }
   0x3   :  { %v66_v8 = vpack.c.bf16 %v42_v4, %v41_v2  ;;  %v73_v9 = vpack.c.bf16 %v56_v6, %v55_v5  ;;  %v39_v10 = vld [vmem:[%s726_s0 + $0x60] sm:$0xff]  ;;  %v40_v11 = vld [vmem:[%s726_s0 + $0x68] sm:$0xff]  ;;  %v53_v14 = vld [vmem:[%s726_s0 + $0xd0] sm:$0xff] }
   0x4   :  { %489 = vmatprep.subr.msk.bf16.mxu0 %vm113_vm0, %v74_v3  ;;  %v65_v13 = vpack.c.bf16 %v40_v11, %v39_v10  ;;  %v54_v15 = vld [vmem:[%s726_s0 + $0xd8] sm:$0xff]  ;;  %v37_v18 = vld [vmem:[%s726_s0 + $0x50] sm:$0xff]  ;;  %v599_v20 = vld [vmem:[%s727_s1] sm:$0xff]  }
   0x5   :  { %v142_v12 = vsel %vm113_vm0, %v66_v8, 0  ;;  %v72_v17 = vpack.c.bf16 %v54_v15, %v53_v14  ;;  %v38_v19 = vld [vmem:[%s726_s0 + $0x58] sm:$0xff]  ;;  %v81_v21 = vld [vmem:[%s728_s2 + $0x10] sm:$0xff]  ;;  %485 = vmatprep.mubr.msk.bf16.mxu0 %vm113_vm0, %v599_v20  ;;  %v79_v22 = vld [vmem:[%s728_s2] sm:$0xff] }
   0x6   :  { %470 = vmatpush3.bf16.xpose.msra.mxu0 %v142_v12  ;;  %v139_v16 = vsel %vm113_vm0, %v65_v13, 0  ;;  %v64_v23 = vpack.c.bf16 %v38_v19, %v37_v18  ;;  %v51_v24 = vld [vmem:[%s726_s0 + $0xc0] sm:$0xff]  ;;  %v52_v25 = vld [vmem:[%s726_s0 + $0xc8] sm:$0xff]  ;;  %95 = vperm.xlu0 %498, %v81_v21   ;;  %v82_v26 = vld [vmem:[%s728_s2 + $0x18] sm:$0xff] }
   0x7   :  { %490 = vmatprep.subr.msk.bf16.mxu0 %vm113_vm0, %v73_v9  ;;  %85 = vperm.xlu1 %499, %v79_v22   ;;  %v80_v27 = vld [vmem:[%s728_s2 + $0x8] sm:$0xff]  ;;  %v71_v29 = vpack.c.bf16 %v52_v25, %v51_v24  ;;  %v35_v30 = vld [vmem:[%s726_s0 + $0x40] sm:$0xff]  ;;  %v239_v32 = vld [vmem:[%s730_s4 + $0x10] sm:$0xff] }
   0x8   :  { %v136_v28 = vsel %vm113_vm0, %v64_v23, 0  ;;  %v36_v31 = vld [vmem:[%s726_s0 + $0x48] sm:$0xff]  ;;  %v240_v33 = vld [vmem:[%s730_s4 + $0x18] sm:$0xff]  ;;  %v49_v35 = vld [vmem:[%s726_s0 + $0xb0] sm:$0xff] }
   0x9   :  { %v63_v34 = vpack.c.bf16 %v36_v31, %v35_v30  ;;  %v50_v36 = vld [vmem:[%s726_s0 + $0xb8] sm:$0xff]  ;;  %v237_v37 = vld [vmem:[%s730_s4] sm:$0xff]  ;;  %v238_v38 = vld [vmem:[%s730_s4 + $0x8] sm:$0xff] }
   0xa   :  { %100 = vperm.xlu0 %498, %v82_v26   ;;  %v70_v40 = vpack.c.bf16 %v50_v36, %v49_v35  ;;  %v33_v41 = vld [vmem:[%s726_s0 + $0x30] sm:$0xff]  ;;  %v34_v42 = vld [vmem:[%s726_s0 + $0x38] sm:$0xff]  ;;  %v344_v43 = vld [vmem:[%s732_s6] sm:$0xff] }
   0xb   :  { %90 = vperm.xlu1 %499, %v80_v27   ;;  %v133_v39 = vsel %vm113_vm0, %v63_v34, 0  ;;  %v62_v44 = vpack.c.bf16 %v34_v42, %v33_v41  ;;  %v47_v45 = vld [vmem:[%s726_s0 + $0xa0] sm:$0xff]  ;;  %v48_v46 = vld [vmem:[%s726_s0 + $0xa8] sm:$0xff]  ;;  %v45_v52 = vld [vmem:[%s726_s0 + $0x90] sm:$0xff] }
   0xc   :  { %v69_v48 = vpack.c.bf16 %v48_v46, %v47_v45  ;;  %v31_v49 = vld [vmem:[%s726_s0 + $0x20] sm:$0xff]  ;;  %v32_v50 = vld [vmem:[%s726_s0 + $0x28] sm:$0xff]  ;;  %v46_v53 = vld [vmem:[%s726_s0 + $0x98] sm:$0xff] }
   0xd   :  { %v130_v47 = vsel %vm113_vm0, %v62_v44, 0  ;;  %v61_v51 = vpack.c.bf16 %v32_v50, %v31_v49  ;;  %v68_v55 = vpack.c.bf16 %v46_v53, %v45_v52  ;;  %v29_v56 = vld [vmem:[%s726_s0 + $0x10] sm:$0xff]  ;;  %v30_v57 = vld [vmem:[%s726_s0 + $0x18] sm:$0xff]  ;;  %v43_v59 = vld [vmem:[%s726_s0 + $0x80] sm:$0xff] }
   0xe   :  { %472 = vmatpush3.bf16.xpose.msra.mxu0 %v139_v16  ;;  %253 = vperm.xlu0 %498, %v239_v32   ;;  %v60_v58 = vpack.c.bf16 %v30_v57, %v29_v56  ;;  %v44_v60 = vld [vmem:[%s726_s0 + $0x88] sm:$0xff]  ;;  %v27_v63 = vld [vmem:[%s726_s0] sm:$0xff] }
   0xf   :  { %491 = vmatprep.subr.msk.bf16.mxu0 %vm113_vm0, %v72_v17  ;;  %258 = vperm.xlu1 %499, %v240_v33   ;;  %v127_v54 = vsel %vm113_vm0, %v61_v51, 0  ;;  %v67_v62 = vpack.c.bf16 %v44_v60, %v43_v59  ;;  %v28_v0 = vld [vmem:[%s726_s0 + $0x8] sm:$0xff] }
  0x10   :  { %v124_v61 = vsel %vm113_vm0, %v60_v58, 0  ;;  %v59_v1 = vpack.c.bf16 %v28_v0, %v27_v63  ;;  %v501_v3 = vld [vmem:[%s727_s1 + $0x8] sm:$0xff]  }
  0x12   :  { %243 = vperm.xlu0 %498, %v237_v37   ;;  %v121_v2 = vsel %vm113_vm0, %v59_v1, 0  ;;  %v502_v37 = vld [vmem:[%s729_s3] sm:$0xff]  }
  0x13   :  { %248 = vperm.xlu1 %499, %v238_v38   ;;  %v503_v38 = vld [vmem:[%s729_s3 + $0x8] sm:$0xff]  }
  0x16   :  { %474 = vmatpush3.bf16.xpose.msra.mxu0 %v136_v28  ;;  %347 = vperm.xlu0 %498, %v344_v43  }
  0x17   :  { %492 = vmatprep.subr.msk.bf16.mxu0 %vm113_vm0, %v71_v29 }
  0x1e   :  { %476 = vmatpush3.bf16.xpose.msra.mxu0 %v133_v39 }
  0x1f   :  { %493 = vmatprep.subr.msk.bf16.mxu0 %vm113_vm0, %v70_v40 }
  0x26   :  { %478 = vmatpush3.bf16.xpose.msra.mxu0 %v130_v47 }
  0x27   :  { %494 = vmatprep.subr.msk.bf16.mxu0 %vm113_vm0, %v69_v48 }
  0x2e   :  { %480 = vmatpush3.bf16.xpose.msra.mxu0 %v127_v54 }
  0x2f   :  { %495 = vmatprep.subr.msk.bf16.mxu0 %vm113_vm0, %v68_v55 }
  0x36   :  { %482 = vmatpush3.bf16.xpose.msra.mxu0 %v124_v61 }
  0x37   :  { %496 = vmatprep.subr.msk.bf16.mxu0 %vm113_vm0, %v67_v62 }
  0x3e   :  { %484 = vmatpush3.bf16.xpose.msra.mxu0 %v121_v2 }
  0x45   :  { %486 = vmatmul.mubr.msk.bf16.vlgmr.msra.gmra.mxu0 %vm113_vm0, %v599_v20 }
  0x46   :  { %487 = vmatprep.mubr.msk.bf16.mxu0 %vm113_vm0, %v501_v3 }
  0x4d   :  { %488 = vmatmul.mubr.msk.bf16.gmra.mxu0 %vm113_vm0, %v501_v3 }
  0x81   :  { %v96_v8 = vpop.permute.xlu0 %95 }
  0x82   :  { %v86_v9 = vpop.permute.xlu1 %85 }
  0x85   :  { %v101_v13 = vpop.permute.xlu0 %100 }
  0x86   :  { %v91_v14 = vpop.permute.xlu1 %90 }
  0x89   :  { %v254_v44 = vpop.permute.xlu0 %253 }
  0x8a   :  { %v259_v42 = vpop.permute.xlu1 %258 }
  0x8d   :  { %v244_v52 = vpop.permute.xlu0 %243 }
  0x8e   :  { %v249_v47 = vpop.permute.xlu1 %248 }
 0x105   :  { %v202_v4 = vpop.f32.mrf.mxu0 }
 0x106   :  { %v203_v28 = vadd.f32 %v202_v4, %v86_v9 }
 0x107   :  { %v204_v5 = vpop.f32.mrf.mxu0 }
 0x108   :  { %v205_v21 = vadd.f32 %v204_v5, %v86_v9  ;;  %v221_v35 = vmax.f32 %v203_v28, 0.0 }
 0x109   :  { %v206_v6 = vpop.f32.mrf.mxu0 }
 0x10a   :  { %v207_v23 = vadd.f32 %v206_v6, %v91_v14  ;;  %v222_v30 = vmax.f32 %v205_v21, 0.0  ;;  %v339_v6 = vld [vmem:[%s731_s5] sm:$0xf] }
 0x10b   :  { %v208_v10 = vpop.f32.mrf.mxu0 }
 0x10c   :  { %v209_v16 = vadd.f32 %v208_v10, %v91_v14  ;;  %v223_v32 = vmax.f32 %v207_v23, 0.0 }
 0x10d   :  { %v212_v11 = vpop.f32.mrf.mxu0 }
 0x10e   :  { %v213_v19 = vadd.f32 %v212_v11, %v96_v8  ;;  %v224_v25 = vmax.f32 %v209_v16, 0.0  ;;  %v233_v36 = vpack.c.bf16 %v223_v32, %v221_v35 }
 0x10f   :  { %v214_v12 = vpop.f32.mrf.mxu0 }
 0x110   :  { %v215_v17 = vadd.f32 %v214_v12, %v96_v8  ;;  %v225_v29 = vmax.f32 %v213_v19, 0.0  ;;  %v234_v34 = vpack.c.bf16 %v224_v25, %v222_v30  ;;  %v348_v8 = vpop.permute.xlu0 %347 }
 0x111   :  { %v216_v15 = vpop.f32.mrf.mxu0 }
 0x112   :  { %v217_v18 = vadd.f32 %v216_v15, %v101_v13  ;;  %v226_v26 = vmax.f32 %v215_v17, 0.0 }
 0x113   :  { %v218_v20 = vpop.f32.mrf.mxu0 }
 0x114   :  { %v219_v22 = vadd.f32 %v218_v20, %v101_v13  ;;  %v227_v24 = vmax.f32 %v217_v18, 0.0 }
 0x116   :  { %v228_v27 = vmax.f32 %v219_v22, 0.0  ;;  %v235_v33 = vpack.c.bf16 %v227_v24, %v225_v29 }
 0x118   :  { %v236_v31 = vpack.c.bf16 %v228_v27, %v226_v26 }
 0x11a   :  { %290 = vmatprep.subr.bf16.mxu1 %v236_v31 }
 0x11b   :  { %291 = vmatpush1.bf16.msra.mxu1 %v235_v33 }
 0x11c   :  { %292 = vmatprep.subr.bf16.mxu1 %v234_v34 }
 0x11f   :  { %293 = vmatpush1.bf16.msra.mxu1 %v233_v36 }
 0x122   :  { %462 = vmatmul.mubr.msk.bf16.vlgmr.msra.gmra.mxu1 %vm271_vm1, %v502_v37 }
 0x123   :  { %320 = vmatprep.mubr.bf16.mxu1 %v512_v7 }
 0x12a   :  { %463 = vmatmul.mubr.msk.bf16.gmra.mxu1 %vm271_vm1, %v503_v38 }
 0x12b   :  { %385 = vmatprep.mubr.bf16.mxu1 %v512_v7 }
 0x1e2   :  { %v312_v39 = vpop.f32.mrf.mxu1 }
 0x1e3   :  { %v313_v61 = vadd.f32 %v312_v39, %v244_v52 }
 0x1e4   :  { %v314_v40 = vpop.f32.mrf.mxu1 }
 0x1e5   :  { %v315_v55 = vadd.f32 %v314_v40, %v244_v52  ;;  %v331_v4 = vmax.f32 %v313_v61, 0.0 }
 0x1e6   :  { %v316_v41 = vpop.f32.mrf.mxu1 }
 0x1e7   :  { %v317_v57 = vadd.f32 %v316_v41, %v249_v47  ;;  %v332_v63 = vmax.f32 %v315_v55, 0.0 }
 0x1e8   :  { %v318_v43 = vpop.f32.mrf.mxu1 }
 0x1e9   :  { %v319_v49 = vadd.f32 %v318_v43, %v249_v47  ;;  %v333_v1 = vmax.f32 %v317_v57, 0.0 }
 0x1ea   :  { %v322_v45 = vpop.f32.mrf.mxu1 }
 0x1eb   :  { %v323_v53 = vadd.f32 %v322_v45, %v254_v44  ;;  %v334_v58 = vmax.f32 %v319_v49, 0.0  ;;  %v340_v5 = vpack.c.bf16 %v333_v1, %v331_v4 }
 0x1ec   :  { %v324_v46 = vpop.f32.mrf.mxu1 }
 0x1ed   :  { %v325_v50 = vadd.f32 %v324_v46, %v254_v44  ;;  %v335_v62 = vmax.f32 %v323_v53, 0.0  ;;  %v341_v3 = vpack.c.bf16 %v334_v58, %v332_v63 }
 0x1ee   :  { %v326_v48 = vpop.f32.mrf.mxu1 }
 0x1ef   :  { %v327_v51 = vadd.f32 %v326_v48, %v259_v42  ;;  %v336_v59 = vmax.f32 %v325_v50, 0.0 }
 0x1f0   :  { %v328_v54 = vpop.f32.mrf.mxu1 }
 0x1f1   :  { %v329_v56 = vadd.f32 %v328_v54, %v259_v42  ;;  %v337_v7 = vmax.f32 %v327_v51, 0.0 }
 0x1f3   :  { %v338_v60 = vmax.f32 %v329_v56, 0.0  ;;  %v342_v2 = vpack.c.bf16 %v337_v7, %v335_v62 }
 0x1f5   :  { %v343_v0 = vpack.c.bf16 %v338_v60, %v336_v59 }
 0x1f7   :  { %365 = vmatprep.subr.bf16.mxu1 %v343_v0 }
 0x1f8   :  { %366 = vmatpush1.bf16.msra.mxu1 %v342_v2 }
 0x1f9   :  { %367 = vmatprep.subr.bf16.mxu1 %v341_v3 }
 0x1fc   :  { %368 = vmatpush1.bf16.msra.mxu1 %v340_v5 }
 0x1ff   :  { %464 = vmatmul.mubr.msk.bf16.vlgmr.msra.gmra.mxu1 %vm271_vm1, %v339_v6 }
 0x2bf   :  { %v387_v9 = vpop.f32.mrf.mxu1 }
 0x2c0   :  { %v388_v10 = vadd.f32 %v387_v9, %v348_v8 }
 0x2c1   :  { %v389_v11 = vpop.f32.mrf.mxu1 }
 0x2c2   :  { %v465_v12 = vmul.f32 -1.442695, %v388_v10  ;;  %v390_v13 = vadd.f32 %v389_v11, %v348_v8 }
 0x2c3   :  { %v391_v14 = vpop.f32.mrf.mxu1 }
 0x2c4   :  { %504 = vpow2.f32 %v465_v12  ;;  %v466_v15 = vmul.f32 -1.442695, %v390_v13 }
 0x2c5   :  { %v392_v16 = vpop.f32.mrf.mxu1 }
 0x2c6   :  { %506 = vpow2.f32 %v466_v15 }
 0x2d1   :  { %v505_v17 = vpop.eup %504 }
 0x2d2   :  { %v400_v18 = vadd.f32 1.0, %v505_v17 }
 0x2d3   :  { %v507_v19 = vpop.eup %506 }
 0x2d4   :  { %v401_v20 = vadd.f32 1.0, %v507_v19  ;;  %508 = vrcp.f32 %v400_v18 }
 0x2d6   :  { %510 = vrcp.f32 %v401_v20 }
 0x2e1   :  { %v509_v21 = vpop.eup %508 }
 0x2e3   :  { %v511_v22 = vpop.eup %510 }
 0x2e4   :  { %v468_v23 = vpack.c.bf16 %v511_v22, %v509_v21 }
 0x2e6   :  { %414 = vst [vmem:[#allocation2] sm:$0xff] %v468_v23 }
 0x2ed   :  { %v433_v24 = vld [vmem:[#allocation2] sm:$0xf] }
 0x2ee   :  { %434 = vst [vmem:[%s733_s7] sm:$0xf] %v433_v24 }

</bundles_post_ra>
